<compile_context>
chip_gen: v7x
topology: tpu7x:2x2x1
jax: 0.10.0
libtpu: 0.0.40
codegen_flags: <defaults>
</compile_context>

<pallas_src>
import functools

import jax
import jax.numpy as jnp
import numpy as np
from jax import lax
from jax.experimental import pallas as pl
from jax.experimental.pallas import tpu as pltpu


# ------------------------------- Pallas kernel ------------------------------ #

def _unet_block_kernel(x_ref, w1_ref, w2_ref, wr_ref,
                       s0_ref, t0_ref, b1_ref, s1_ref, t1_ref, bo_ref,
                       o_ref, *, H):
    """Fused UNetConvBlock forward for one image (one grid step).

    x_ref : (H+4, (W+4)*Cin) f32   zero-padded input slab (lane-dense [row, col*C])
    w1_ref: (3, (W+4)*Cin, (W+2)*Cout) bf16 banded conv1 weights (one per dy)
    w2_ref: (3, (W+2)*Cout, W*Cout)    bf16 banded conv2 weights (one per dy)
    wr_ref: ((W+4)*Cin, W*Cout)        f32  banded 1x1 residual weights (BN_r folded)
    s0/t0 : (1,(W+4)*Cin) / (H+4,(W+4)*Cin) BN0 affine (shift zeroed on padding)
    b1    : (1,(W+2)*Cout)                  conv1 bias
    s1/t1 : (H+2,(W+2)*Cout)                BN1 affine (zeroed on the halo ring)
    bo    : (1, W*Cout)                     conv2 bias + folded residual bias
    o_ref : (H, W*Cout) f32 output block (lane-dense, 128 lanes)
    """
    x = x_ref[...]                                              # (H+4, Lx) f32

    # pre-block: ReLU + BN0 (padding rows/cols forced to exactly 0 via t0 slab)
    h0 = jnp.maximum(x, 0.0) * s0_ref[...] + t0_ref[...]
    h0b = h0.astype(jnp.bfloat16)                               # cast once

    # conv1 3x3 (pad=1): 3 banded matmuls (dx folded into the weights),
    # chained into one accumulator with no zeros init.
    acc = jnp.dot(h0b[0:H + 2], w1_ref[0], preferred_element_type=jnp.float32)
    acc = acc + jnp.dot(h0b[1:H + 3], w1_ref[1], preferred_element_type=jnp.float32)
    acc = acc + jnp.dot(h0b[2:H + 4], w1_ref[2], preferred_element_type=jnp.float32)

    # ReLU + BN1; the 1-pixel halo ring is forced to exactly 0 (= conv2's
    # zero padding) because s1/t1 slabs are zero there.
    h1 = jnp.maximum(acc + b1_ref[...], 0.0) * s1_ref[...] + t1_ref[...]
    h1b = h1.astype(jnp.bfloat16)                               # cast once

    # conv2 3x3 (pad=1): 3 banded matmuls
    out = jnp.dot(h1b[0:H], w2_ref[0], preferred_element_type=jnp.float32)
    out = out + jnp.dot(h1b[1:H + 1], w2_ref[1], preferred_element_type=jnp.float32)
    out = out + jnp.dot(h1b[2:H + 2], w2_ref[2], preferred_element_type=jnp.float32)

    # residual path: 1x1 conv on the raw input (f32 lhs for accuracy),
    # BN_r scale folded into wr, BN_r shift + biases folded into bo.
    res = jnp.dot(x[2:2 + H], wr_ref[...], preferred_element_type=jnp.float32)

    o_ref[...] = out + res + bo_ref[...]


# --------------------------- wrapper / preprocessing ------------------------ #

def _range_mask(n, lo, hi):
    i = jnp.arange(n)
    return ((i >= lo) & (i < hi)).astype(jnp.float32)


def _banded_conv3_weights(w_oihw, in_cols, out_cols):
    """3x3 conv (OIHW) -> 3 banded matrices (one per dy) of shape
    (in_cols*Cin, out_cols*Cout) for the lane-dense [row, col*C] layout.
    Input column p feeds output column q iff p == q + dx, dx in {0,1,2}."""
    Co, Ci, _, _ = w_oihw.shape
    p_idx = jnp.arange(in_cols)[:, None]
    q_idx = jnp.arange(out_cols)[None, :]
    mats = []
    for dy in range(3):
        m = jnp.zeros((in_cols, Ci, out_cols, Co), jnp.float32)
        for dx in range(3):
            sel = (p_idx == q_idx + dx).astype(jnp.float32)
            blk = jnp.transpose(w_oihw[:, :, dy, dx], (1, 0))       # (Ci, Co)
            m = m + jnp.einsum("pq,io->piqo", sel, blk)
        mats.append(m.reshape(in_cols * Ci, out_cols * Co))
    return jnp.stack(mats)


def _banded_1x1_weights(w_io, in_cols, out_cols, offset):
    """1x1 conv weights (Cin, Cout) -> ((in_cols*Cin), (out_cols*Cout)) banded
    matrix mapping input column q+offset to output column q."""
    sel = (jnp.arange(in_cols)[:, None] == jnp.arange(out_cols)[None, :] + offset)
    m = jnp.einsum("pq,io->piqo", sel.astype(jnp.float32), w_io)
    return m.reshape(in_cols * w_io.shape[0], out_cols * w_io.shape[1])


def unet_conv_block_forward(x_nchw, p):
    N, Cin, H, W = x_nchw.shape
    Cout = p["w1"].shape[0]
    Lx, L1, Lo = (W + 4) * Cin, (W + 2) * Cout, W * Cout

    # NHWC, zero-pad by 2 (halo for the two stacked 3x3 convs), flatten each
    # row into a lane-dense [col*C] slab.
    x = jnp.transpose(x_nchw, (0, 2, 3, 1)).astype(jnp.float32)
    xp = jnp.pad(x, ((0, 0), (2, 2), (2, 2), (0, 0))).reshape(N, H + 4, Lx)

    # ---- parameter preprocessing (tiny, done once / fused by XLA) ------------
    s0 = p["bn0_scale"].reshape(-1); t0 = p["bn0_shift"].reshape(-1)
    s1 = p["bn1_scale"].reshape(-1); t1 = p["bn1_shift"].reshape(-1)
    sr = p["bnr_scale"].reshape(-1); tr = p["bnr_shift"].reshape(-1)
    b1 = p["b1"].reshape(-1); b2 = p["b2"].reshape(-1); br = p["br"].reshape(-1)

    # banded conv weights (dx taps folded); bf16 for the MXU
    w1b = _banded_conv3_weights(p["w1"], W + 4, W + 2).astype(jnp.bfloat16)
    w2b = _banded_conv3_weights(p["w2"], W + 2, W).astype(jnp.bfloat16)

    # fold BN_r exactly into the 1x1 residual conv (no ReLU/padding in between);
    # keep it f32 so the skip connection is not quantized.
    wr = jnp.transpose(p["wr"][:, :, 0, 0], (1, 0)) * sr[None, :]    # (Cin, Cout)
    wrb = _banded_1x1_weights(wr, W + 4, W, 2)                       # f32
    bo = b2 + br * sr + tr

    # BN affine / bias slabs in the [row, col*C] layout. Shifts/scales are
    # zeroed on padding rows & columns so h0 / h1 are exactly 0 where the
    # convs' zero padding lives (border masks pre-baked, no in-kernel masking).
    col0_ok = _range_mask(W + 4, 2, W + 2)
    row0_ok = _range_mask(H + 4, 2, H + 2)
    col1_ok = _range_mask(W + 2, 1, W + 1)
    row1_ok = _range_mask(H + 2, 1, H + 1)
    s0_row = jnp.broadcast_to(s0[None, :], (W + 4, Cin)).reshape(1, Lx)
    t0_full = row0_ok[:, None] * (t0[None, :] * col0_ok[:, None]).reshape(1, Lx)
    b1_row = jnp.broadcast_to(b1[None, :], (W + 2, Cout)).reshape(1, L1)
    s1_full = row1_ok[:, None] * (s1[None, :] * col1_ok[:, None]).reshape(1, L1)
    t1_full = row1_ok[:, None] * (t1[None, :] * col1_ok[:, None]).reshape(1, L1)
    bo_row = jnp.broadcast_to(bo[None, :], (W, Cout)).reshape(1, Lo)

    kernel = functools.partial(_unet_block_kernel, H=H)
    out = pl.pallas_call(
        kernel,
        out_shape=jax.ShapeDtypeStruct((N, H, Lo), jnp.float32),
        grid=(N,),
        in_specs=[
            pl.BlockSpec((None, H + 4, Lx), lambda b: (b, 0, 0)),   # pipelined input
            pl.BlockSpec((3, Lx, L1), lambda b: (0, 0, 0)),         # conv1 bands
            pl.BlockSpec((3, L1, Lo), lambda b: (0, 0, 0)),         # conv2 bands
            pl.BlockSpec((Lx, Lo), lambda b: (0, 0)),               # residual band
            pl.BlockSpec((1, Lx), lambda b: (0, 0)),                # BN0 scale
            pl.BlockSpec((H + 4, Lx), lambda b: (0, 0)),            # BN0 shift slab
            pl.BlockSpec((1, L1), lambda b: (0, 0)),                # conv1 bias
            pl.BlockSpec((H + 2, L1), lambda b: (0, 0)),            # BN1 scale slab
            pl.BlockSpec((H + 2, L1), lambda b: (0, 0)),            # BN1 shift slab
            pl.BlockSpec((1, Lo), lambda b: (0, 0)),                # fused out bias
        ],
        out_specs=pl.BlockSpec((None, H, Lo), lambda b: (b, 0, 0)),
        compiler_params=pltpu.CompilerParams(
            dimension_semantics=("parallel",),
            vmem_limit_bytes=16 * 1024 * 1024),
    )(xp, w1b, w2b, wrb, s0_row, t0_full, b1_row, s1_full, t1_full, bo_row)

    out = out.reshape(N, H, W, Cout)
    return jnp.transpose(out, (0, 3, 1, 2))                          # back to NCHW


# ------------------------------ reference (JAX) ----------------------------- #

def _conv_ref(x_nhwc, w_oihw, b, padding):
    w_hwio = jnp.transpose(w_oihw, (2, 3, 1, 0))
    y = lax.conv_general_dilated(x_nhwc, w_hwio, (1, 1),
                                 [(padding, padding), (padding, padding)],
                                 dimension_numbers=("NHWC", "HWIO", "NHWC"))
    return y + b


def ref_forward(x_nchw, p):
    x = jnp.transpose(x_nchw, (0, 2, 3, 1)).astype(jnp.float32)
    h = jnp.maximum(x, 0.0) * p["bn0_scale"] + p["bn0_shift"]
    h = _conv_ref(h, p["w1"], p["b1"], 1)
    h = jnp.maximum(h, 0.0) * p["bn1_scale"] + p["bn1_shift"]
    h = _conv_ref(h, p["w2"], p["b2"], 1)
    r = _conv_ref(x, p["wr"], p["br"], 0)
    r = r * p["bnr_scale"] + p["bnr_shift"]
    return jnp.transpose(h + r, (0, 3, 1, 2))


# ------------------------------ params / main ------------------------------- #

def make_params(key, cin, cout):
    ks = jax.random.split(key, 20)
    eps = 1e-5

    def bn(kg, kb, km, kv, c):
        gamma = 1.0 + 0.1 * jax.random.normal(kg, (c,), jnp.float32)
        beta = 0.1 * jax.random.normal(kb, (c,), jnp.float32)
        mean = 0.1 * jax.random.normal(km, (c,), jnp.float32)
        var = 0.5 + jax.random.uniform(kv, (c,), jnp.float32)
        scale = gamma / jnp.sqrt(var + eps)
        shift = beta - mean * scale
        return scale.reshape(1, c), shift.reshape(1, c)

    p = {}
    p["bn0_scale"], p["bn0_shift"] = bn(ks[0], ks[1], ks[2], ks[3], cin)
    p["w1"] = 0.1 * jax.random.normal(ks[4], (cout, cin, 3, 3), jnp.float32)
    p["b1"] = 0.1 * jax.random.normal(ks[5], (1, cout), jnp.float32)
    p["bn1_scale"], p["bn1_shift"] = bn(ks[6], ks[7], ks[8], ks[9], cout)
    p["w2"] = 0.1 * jax.random.normal(ks[10], (cout, cout, 3, 3), jnp.float32)
    p["b2"] = 0.1 * jax.random.normal(ks[11], (1, cout), jnp.float32)
    p["wr"] = 0.1 * jax.random.normal(ks[12], (cout, cin, 1, 1), jnp.float32)
    p["br"] = 0.1 * jax.random.normal(ks[13], (1, cout), jnp.float32)
    p["bnr_scale"], p["bnr_shift"] = bn(ks[14], ks[15], ks[16], ks[17], cout)
    return p


if __name__ == "__main__":
    N, CIN, COUT, H, W = 2, 4, 8, 16, 16
    key = jax.random.PRNGKey(0)
    kx, kp = jax.random.split(key)
    x = jax.random.normal(kx, (N, CIN, H, W), jnp.float32)
    params = make_params(kp, CIN, COUT)

    fwd = jax.jit(unet_conv_block_forward)
    out = jax.block_until_ready(fwd(x, params))
    assert out.shape == (N, COUT, H, W)

    ref = ref_forward(x, params)
    # main-path matmuls run in bf16 (f32 accumulation); residual path is f32
    np.testing.assert_allclose(np.asarray(out), np.asarray(ref),
                               rtol=3e-2, atol=3e-2)
    print("KERNEL_OK")
</pallas_src>

<mosaic_0001>
module attributes {stable_mosaic.version = 11 : i64} {
  func.func @_unet_block_kernel(%arg0: i32, %arg1: memref<1x20x80xf32, #tpu.memory_space<vmem>>, %arg2: memref<3x80x144xbf16, #tpu.memory_space<vmem>>, %arg3: memref<3x144x128xbf16, #tpu.memory_space<vmem>>, %arg4: memref<80x128xf32, #tpu.memory_space<vmem>>, %arg5: memref<1x80xf32, #tpu.memory_space<vmem>>, %arg6: memref<20x80xf32, #tpu.memory_space<vmem>>, %arg7: memref<1x144xf32, #tpu.memory_space<vmem>>, %arg8: memref<18x144xf32, #tpu.memory_space<vmem>>, %arg9: memref<18x144xf32, #tpu.memory_space<vmem>>, %arg10: memref<1x128xf32, #tpu.memory_space<vmem>>, %arg11: memref<1x16x128xf32, #tpu.memory_space<vmem>>) attributes {dimension_semantics = [#tpu.dimension_semantics<parallel>], iteration_bounds = array<i64: 2>, scalar_prefetch = 0 : i64, scratch_operands = 0 : i64, tpu.core_type = #tpu.core_type<tc>, window_params = [{transform_indices = @transform_0, window_bounds = array<i64: 1, 20, 80>}, {pipeline_mode = #tpu.pipeline_mode<synchronous>, transform_indices = @transform_1, window_bounds = array<i64: 3, 80, 144>}, {pipeline_mode = #tpu.pipeline_mode<synchronous>, transform_indices = @transform_2, window_bounds = array<i64: 3, 144, 128>}, {pipeline_mode = #tpu.pipeline_mode<synchronous>, transform_indices = @transform_3, window_bounds = array<i64: 80, 128>}, {pipeline_mode = #tpu.pipeline_mode<synchronous>, transform_indices = @transform_4, window_bounds = array<i64: 1, 80>}, {pipeline_mode = #tpu.pipeline_mode<synchronous>, transform_indices = @transform_5, window_bounds = array<i64: 20, 80>}, {pipeline_mode = #tpu.pipeline_mode<synchronous>, transform_indices = @transform_6, window_bounds = array<i64: 1, 144>}, {pipeline_mode = #tpu.pipeline_mode<synchronous>, transform_indices = @transform_7, window_bounds = array<i64: 18, 144>}, {pipeline_mode = #tpu.pipeline_mode<synchronous>, transform_indices = @transform_8, window_bounds = array<i64: 18, 144>}, {pipeline_mode = #tpu.pipeline_mode<synchronous>, transform_indices = @transform_9, window_bounds = array<i64: 1, 128>}, {transform_indices = @transform_10, window_bounds = array<i64: 1, 16, 128>}]} {
    %c0 = arith.constant 0 : index
    %c0_0 = arith.constant 0 : index
    %c0_1 = arith.constant 0 : index
    %0 = vector.load %arg1[%c0, %c0_0, %c0_1] : memref<1x20x80xf32, #tpu.memory_space<vmem>>, vector<1x20x80xf32>
    %1 = vector.shape_cast %0 : vector<1x20x80xf32> to vector<20x80xf32>
    %cst = arith.constant 0.000000e+00 : f32
    %2 = vector.broadcast %cst : f32 to vector<20x80xf32>
    %3 = arith.maximumf %1, %2 : vector<20x80xf32>
    %c0_2 = arith.constant 0 : index
    %c0_3 = arith.constant 0 : index
    %4 = vector.load %arg5[%c0_2, %c0_3] : memref<1x80xf32, #tpu.memory_space<vmem>>, vector<1x80xf32>
    %5 = vector.broadcast %4 : vector<1x80xf32> to vector<20x80xf32>
    %6 = arith.mulf %3, %5 : vector<20x80xf32>
    %c0_4 = arith.constant 0 : index
    %c0_5 = arith.constant 0 : index
    %7 = vector.load %arg6[%c0_4, %c0_5] : memref<20x80xf32, #tpu.memory_space<vmem>>, vector<20x80xf32>
    %8 = arith.addf %6, %7 : vector<20x80xf32>
    %9 = arith.truncf %8 : vector<20x80xf32> to vector<20x80xbf16>
    %10 = vector.extract_strided_slice %9 {offsets = [0, 0], sizes = [18, 80], strides = [1, 1]} : vector<20x80xbf16> to vector<18x80xbf16>
    %c0_6 = arith.constant 0 : index
    %c0_7 = arith.constant 0 : index
    %c0_8 = arith.constant 0 : index
    %11 = vector.load %arg2[%c0_6, %c0_7, %c0_8] : memref<3x80x144xbf16, #tpu.memory_space<vmem>>, vector<1x80x144xbf16>
    %12 = vector.shape_cast %11 : vector<1x80x144xbf16> to vector<80x144xbf16>
    %cst_9 = arith.constant dense<0.000000e+00> : vector<18x144xf32>
    %13 = tpu.matmul %10, %12, %cst_9 {dimension_numbers = #tpu.dot_dimension_numbers<[1], [0], [0], [1], [0, 0, 1, 1], [], []>} : vector<18x80xbf16>, vector<80x144xbf16>, vector<18x144xf32> -> vector<18x144xf32>
    %14 = vector.extract_strided_slice %9 {offsets = [1, 0], sizes = [18, 80], strides = [1, 1]} : vector<20x80xbf16> to vector<18x80xbf16>
    %c1 = arith.constant 1 : index
    %c0_10 = arith.constant 0 : index
    %c0_11 = arith.constant 0 : index
    %15 = vector.load %arg2[%c1, %c0_10, %c0_11] : memref<3x80x144xbf16, #tpu.memory_space<vmem>>, vector<1x80x144xbf16>
    %16 = vector.shape_cast %15 : vector<1x80x144xbf16> to vector<80x144xbf16>
    %cst_12 = arith.constant dense<0.000000e+00> : vector<18x144xf32>
    %17 = tpu.matmul %14, %16, %cst_12 {dimension_numbers = #tpu.dot_dimension_numbers<[1], [0], [0], [1], [0, 0, 1, 1], [], []>} : vector<18x80xbf16>, vector<80x144xbf16>, vector<18x144xf32> -> vector<18x144xf32>
    %18 = arith.addf %13, %17 : vector<18x144xf32>
    %19 = vector.extract_strided_slice %9 {offsets = [2, 0], sizes = [18, 80], strides = [1, 1]} : vector<20x80xbf16> to vector<18x80xbf16>
    %c2 = arith.constant 2 : index
    %c0_13 = arith.constant 0 : index
    %c0_14 = arith.constant 0 : index
    %20 = vector.load %arg2[%c2, %c0_13, %c0_14] : memref<3x80x144xbf16, #tpu.memory_space<vmem>>, vector<1x80x144xbf16>
    %21 = vector.shape_cast %20 : vector<1x80x144xbf16> to vector<80x144xbf16>
    %cst_15 = arith.constant dense<0.000000e+00> : vector<18x144xf32>
    %22 = tpu.matmul %19, %21, %cst_15 {dimension_numbers = #tpu.dot_dimension_numbers<[1], [0], [0], [1], [0, 0, 1, 1], [], []>} : vector<18x80xbf16>, vector<80x144xbf16>, vector<18x144xf32> -> vector<18x144xf32>
    %23 = arith.addf %18, %22 : vector<18x144xf32>
    %c0_16 = arith.constant 0 : index
    %c0_17 = arith.constant 0 : index
    %24 = vector.load %arg7[%c0_16, %c0_17] : memref<1x144xf32, #tpu.memory_space<vmem>>, vector<1x144xf32>
    %25 = vector.broadcast %24 : vector<1x144xf32> to vector<18x144xf32>
    %26 = arith.addf %23, %25 : vector<18x144xf32>
    %cst_18 = arith.constant 0.000000e+00 : f32
    %27 = vector.broadcast %cst_18 : f32 to vector<18x144xf32>
    %28 = arith.maximumf %26, %27 : vector<18x144xf32>
    %c0_19 = arith.constant 0 : index
    %c0_20 = arith.constant 0 : index
    %29 = vector.load %arg8[%c0_19, %c0_20] : memref<18x144xf32, #tpu.memory_space<vmem>>, vector<18x144xf32>
    %30 = arith.mulf %28, %29 : vector<18x144xf32>
    %c0_21 = arith.constant 0 : index
    %c0_22 = arith.constant 0 : index
    %31 = vector.load %arg9[%c0_21, %c0_22] : memref<18x144xf32, #tpu.memory_space<vmem>>, vector<18x144xf32>
    %32 = arith.addf %30, %31 : vector<18x144xf32>
    %33 = arith.truncf %32 : vector<18x144xf32> to vector<18x144xbf16>
    %34 = vector.extract_strided_slice %33 {offsets = [0, 0], sizes = [16, 144], strides = [1, 1]} : vector<18x144xbf16> to vector<16x144xbf16>
    %c0_23 = arith.constant 0 : index
    %c0_24 = arith.constant 0 : index
    %c0_25 = arith.constant 0 : index
    %35 = vector.load %arg3[%c0_23, %c0_24, %c0_25] : memref<3x144x128xbf16, #tpu.memory_space<vmem>>, vector<1x144x128xbf16>
    %36 = vector.shape_cast %35 : vector<1x144x128xbf16> to vector<144x128xbf16>
    %cst_26 = arith.constant dense<0.000000e+00> : vector<16x128xf32>
    %37 = tpu.matmul %34, %36, %cst_26 {dimension_numbers = #tpu.dot_dimension_numbers<[1], [0], [0], [1], [0, 0, 1, 1], [], []>} : vector<16x144xbf16>, vector<144x128xbf16>, vector<16x128xf32> -> vector<16x128xf32>
    %38 = vector.extract_strided_slice %33 {offsets = [1, 0], sizes = [16, 144], strides = [1, 1]} : vector<18x144xbf16> to vector<16x144xbf16>
    %c1_27 = arith.constant 1 : index
    %c0_28 = arith.constant 0 : index
    %c0_29 = arith.constant 0 : index
    %39 = vector.load %arg3[%c1_27, %c0_28, %c0_29] : memref<3x144x128xbf16, #tpu.memory_space<vmem>>, vector<1x144x128xbf16>
    %40 = vector.shape_cast %39 : vector<1x144x128xbf16> to vector<144x128xbf16>
    %cst_30 = arith.constant dense<0.000000e+00> : vector<16x128xf32>
    %41 = tpu.matmul %38, %40, %cst_30 {dimension_numbers = #tpu.dot_dimension_numbers<[1], [0], [0], [1], [0, 0, 1, 1], [], []>} : vector<16x144xbf16>, vector<144x128xbf16>, vector<16x128xf32> -> vector<16x128xf32>
    %42 = arith.addf %37, %41 : vector<16x128xf32>
    %43 = vector.extract_strided_slice %33 {offsets = [2, 0], sizes = [16, 144], strides = [1, 1]} : vector<18x144xbf16> to vector<16x144xbf16>
    %c2_31 = arith.constant 2 : index
    %c0_32 = arith.constant 0 : index
    %c0_33 = arith.constant 0 : index
    %44 = vector.load %arg3[%c2_31, %c0_32, %c0_33] : memref<3x144x128xbf16, #tpu.memory_space<vmem>>, vector<1x144x128xbf16>
    %45 = vector.shape_cast %44 : vector<1x144x128xbf16> to vector<144x128xbf16>
    %cst_34 = arith.constant dense<0.000000e+00> : vector<16x128xf32>
    %46 = tpu.matmul %43, %45, %cst_34 {dimension_numbers = #tpu.dot_dimension_numbers<[1], [0], [0], [1], [0, 0, 1, 1], [], []>} : vector<16x144xbf16>, vector<144x128xbf16>, vector<16x128xf32> -> vector<16x128xf32>
    %47 = arith.addf %42, %46 : vector<16x128xf32>
    %48 = vector.extract_strided_slice %1 {offsets = [2, 0], sizes = [16, 80], strides = [1, 1]} : vector<20x80xf32> to vector<16x80xf32>
    %c0_35 = arith.constant 0 : index
    %c0_36 = arith.constant 0 : index
    %49 = vector.load %arg4[%c0_35, %c0_36] : memref<80x128xf32, #tpu.memory_space<vmem>>, vector<80x128xf32>
    %cst_37 = arith.constant dense<0.000000e+00> : vector<16x128xf32>
    %50 = tpu.matmul %48, %49, %cst_37 {dimension_numbers = #tpu.dot_dimension_numbers<[1], [0], [0], [1], [0, 0, 1, 1], [], []>} : vector<16x80xf32>, vector<80x128xf32>, vector<16x128xf32> -> vector<16x128xf32>
    %51 = arith.addf %47, %50 : vector<16x128xf32>
    %c0_38 = arith.constant 0 : index
    %c0_39 = arith.constant 0 : index
    %52 = vector.load %arg10[%c0_38, %c0_39] : memref<1x128xf32, #tpu.memory_space<vmem>>, vector<1x128xf32>
    %53 = vector.broadcast %52 : vector<1x128xf32> to vector<16x128xf32>
    %54 = arith.addf %51, %53 : vector<16x128xf32>
    %c0_40 = arith.constant 0 : index
    %c0_41 = arith.constant 0 : index
    %c0_42 = arith.constant 0 : index
    %55 = vector.load %arg11[%c0_40, %c0_41, %c0_42] : memref<1x16x128xf32, #tpu.memory_space<vmem>>, vector<1x16x128xf32>
    %56 = vector.shape_cast %55 : vector<1x16x128xf32> to vector<16x128xf32>
    %57 = vector.shape_cast %54 : vector<16x128xf32> to vector<1x16x128xf32>
    tpu.vector_store %arg11[%c0_40, %c0_41, %c0_42], %57 {strides = array<i32>} : memref<1x16x128xf32, #tpu.memory_space<vmem>>, vector<1x16x128xf32>,
    return
  }
  func.func @transform_0(%arg0: i32) -> (i32, i32, i32) {
    %c0_i32 = arith.constant 0 : i32
    %c0_i32_0 = arith.constant 0 : i32
    %c0_i32_1 = arith.constant 0 : i32
    return %arg0, %c0_i32, %c0_i32_0 : i32, i32, i32
  }
  func.func @transform_1(%arg0: i32) -> (i32, i32, i32) {
    %c0_i32 = arith.constant 0 : i32
    %c0_i32_0 = arith.constant 0 : i32
    %c0_i32_1 = arith.constant 0 : i32
    %c0_i32_2 = arith.constant 0 : i32
    return %c0_i32, %c0_i32_0, %c0_i32_1 : i32, i32, i32
  }
  func.func @transform_2(%arg0: i32) -> (i32, i32, i32) {
    %c0_i32 = arith.constant 0 : i32
    %c0_i32_0 = arith.constant 0 : i32
    %c0_i32_1 = arith.constant 0 : i32
    %c0_i32_2 = arith.constant 0 : i32
    return %c0_i32, %c0_i32_0, %c0_i32_1 : i32, i32, i32
  }
  func.func @transform_3(%arg0: i32) -> (i32, i32) {
    %c0_i32 = arith.constant 0 : i32
    %c0_i32_0 = arith.constant 0 : i32
    %c0_i32_1 = arith.constant 0 : i32
    return %c0_i32, %c0_i32_0 : i32, i32
  }
  func.func @transform_4(%arg0: i32) -> (i32, i32) {
    %c0_i32 = arith.constant 0 : i32
    %c0_i32_0 = arith.constant 0 : i32
    %c0_i32_1 = arith.constant 0 : i32
    return %c0_i32, %c0_i32_0 : i32, i32
  }
  func.func @transform_5(%arg0: i32) -> (i32, i32) {
    %c0_i32 = arith.constant 0 : i32
    %c0_i32_0 = arith.constant 0 : i32
    %c0_i32_1 = arith.constant 0 : i32
    return %c0_i32, %c0_i32_0 : i32, i32
  }
  func.func @transform_6(%arg0: i32) -> (i32, i32) {
    %c0_i32 = arith.constant 0 : i32
    %c0_i32_0 = arith.constant 0 : i32
    %c0_i32_1 = arith.constant 0 : i32
    return %c0_i32, %c0_i32_0 : i32, i32
  }
  func.func @transform_7(%arg0: i32) -> (i32, i32) {
    %c0_i32 = arith.constant 0 : i32
    %c0_i32_0 = arith.constant 0 : i32
    %c0_i32_1 = arith.constant 0 : i32
    return %c0_i32, %c0_i32_0 : i32, i32
  }
  func.func @transform_8(%arg0: i32) -> (i32, i32) {
    %c0_i32 = arith.constant 0 : i32
    %c0_i32_0 = arith.constant 0 : i32
    %c0_i32_1 = arith.constant 0 : i32
    return %c0_i32, %c0_i32_0 : i32, i32
  }
  func.func @transform_9(%arg0: i32) -> (i32, i32) {
    %c0_i32 = arith.constant 0 : i32
    %c0_i32_0 = arith.constant 0 : i32
    %c0_i32_1 = arith.constant 0 : i32
    return %c0_i32, %c0_i32_0 : i32, i32
  }
  func.func @transform_10(%arg0: i32) -> (i32, i32, i32) {
    %c0_i32 = arith.constant 0 : i32
    %c0_i32_0 = arith.constant 0 : i32
    %c0_i32_1 = arith.constant 0 : i32
    return %arg0, %c0_i32, %c0_i32_0 : i32, i32, i32
  }
}

</mosaic_0001>

<bundles_post_ra>
// kernel: unet_conv_block_forward.1
= control target key start
LH: loop header
LB: loop body
LE: loop exit
PB: predicated region body
PF: predicated region fallthrough
CT: control target
= control target key end

     0   :  { %s1725_s13 = smov 0   ;;  %s2084_s0 = inlined_call_operand.vmem [shape: f32[2,20,80], index: 0, kind: input, shape index: {}]   ;;  %s2085_s1 = inlined_call_operand.vmem [shape: bf16[3,80,144], index: 1, kind: input, shape index: {}]   ;;  %s2086_s2 = inlined_call_operand.vmem [shape: bf16[3,144,128], index: 2, kind: input, shape index: {}]   ;;  %s2087_s3 = inlined_call_operand.vmem [shape: f32[80,128], index: 3, kind: input, shape index: {}]   ;;  %s2088_s4 = inlined_call_operand.vmem [shape: f32[1,80], index: 4, kind: input, shape index: {}]   ;;  %s2089_s5 = inlined_call_operand.vmem [shape: f32[20,80], index: 5, kind: input, shape index: {}]   ;;  %s2090_s6 = inlined_call_operand.vmem [shape: f32[1,144], index: 6, kind: input, shape index: {}]   ;;  %s2091_s7 = inlined_call_operand.vmem [shape: f32[18,144], index: 7, kind: input, shape index: {}]   ;;  %s2092_s8 = inlined_call_operand.vmem [shape: f32[18,144], index: 8, kind: input, shape index: {}]   ;;  %s2093_s9 = inlined_call_operand.vmem [shape: f32[1,128], index: 9, kind: input, shape index: {}]   ;;  %s2094_s10 = inlined_call_operand.vmem [shape: f32[2,16,128], index: 10, kind: output, shape index: {}]  }
   0x1 LB: > { %s1371_s14 = sadd.s32 4294967295, %s1667_s13   ;;  %p1375_p0 = scmp.ge.s32.totalorder %s1667_s13, 1  ;;  %s1667_s13 = sphi %s1725_s13, %s20_s13  }
   0x2   : > { %p312_p1 = scmp.lt.s32.totalorder %s1667_s13, 3 }
   0x4   : > { %p313_p2 = pnand %p1375_p0, %p312_p1 }
   0x5   : > { %v1589_v0 = vld [vmem:[%s2085_s1 + $0x54] ss:$8 sps:$4 sm:$0xff] (!%p313_p2)   ;;  %p350_p3 = scmp.lt.s32.totalorder (!%p313_p2), %s1371_s14, 1  ;;  %v1591_v1 = vld [vmem:[%s2085_s1 + $0x50] ss:$8 sps:$4 sm:$0xff] (!%p313_p2)   ;;  %v1669_v2 = vmov (!%p313_p2), 0  }
   0x6   : > { %316 = sbr.rel (%p313_p2) target bundleno = 603 (0x25b), region = 60  ;;  %511 = vmatprep.mubr.bf16.mxu0 (!%p313_p2), %v1669_v2  ;;  %937 = vmatprep.subr.bf16.mxu1 (!%p313_p2), %v1669_v2  ;;  %v1592_v3 = vld [vmem:[%s2085_s1 + $0x64] ss:$8 sps:$4 sm:$0xff] (!%p313_p2)   ;;  %v1594_v4 = vld [vmem:[%s2085_s1 + $0x60] ss:$8 sps:$4 sm:$0xff] (!%p313_p2)   ;;  %vm472_vm1 = vcmask (!%p313_p2), 654336  }
   0x7   : > { %479 = vmatprep.subr.bf16.mxu0 (!%p313_p2), %v1589_v0  ;;  %v1595_v5 = vld [vmem:[%s2085_s1 + $0x74] ss:$8 sps:$4 sm:$0xff] (!%p313_p2)   ;;  %v1597_v6 = vld [vmem:[%s2085_s1 + $0x70] ss:$8 sps:$4 sm:$0xff] (!%p313_p2)   ;;  %v1598_v7 = vld [vmem:[%s2085_s1 + $0x84] ss:$8 sps:$4 sm:$0xff] (!%p313_p2)  }
   0x8   : > { %480 = vmatpush1.bf16.msra.mxu0 (!%p313_p2), %v1591_v1  ;;  %v1379_v14 = vld [vmem:[%s2088_s4] ss:$0 sm:$0xff] (!%p313_p2)  ;;  %v378_v16 = vld [vmem:[%s2089_s5 + $0x8] sm:$0xff] (!%p313_p2)  ;;  %v379_v17 = vld [vmem:[%s2089_s5 + $0x10] sm:$0xf] (!%p313_p2)  ;;  %vm648_vm2 = vcmask (!%p313_p2), 1046528  }
   0x9   : > { %481 = vmatprep.subr.bf16.mxu0 (!%p313_p2), %v1592_v3  ;;  %v377_v15 = vld [vmem:[%s2089_s5] sm:$0xff] (!%p313_p2)  ;;  %v1601_v22 = vld [vmem:[%s2085_s1 + $0x94] ss:$8 sps:$4 sm:$0xff] (!%p313_p2)   ;;  %v1603_v26 = vld [vmem:[%s2085_s1 + $0x90] ss:$8 sps:$4 sm:$0xff] (!%p313_p2)   ;;  %vm1218_vm3 = vcmask (!%p313_p2), 1045504  }
   0xa   : > { %v1600_v18 = vld [vmem:[%s2085_s1 + $0x80] ss:$8 sps:$4 sm:$0xff] (!%p313_p2)   ;;  %v1606_v29 = vld [vmem:[%s2085_s1 + $0x4] ss:$8 sps:$4 sm:$0xff] (!%p313_p2)   ;;  %vm406_vm0 = vsmask.f32 (!%p313_p2), 7424 }
   0xb   : > { %v1604_v35 = vld [vmem:[%s2085_s1] ss:$8 sps:$4 sm:$0xff] (!%p313_p2)   ;;  %v1609_v37 = vld [vmem:[%s2085_s1 + $0x14] ss:$8 sps:$4 sm:$0xff] (!%p313_p2)   ;;  %v1607_v39 = vld [vmem:[%s2085_s1 + $0x10] ss:$8 sps:$4 sm:$0xff] (!%p313_p2)  }
   0xc   : > { %482 = vmatpush1.bf16.msra.mxu0 (!%p313_p2), %v1594_v4  ;;  %v1612_v41 = vld [vmem:[%s2085_s1 + $0x24] ss:$8 sps:$4 sm:$0xff] (!%p313_p2)   ;;  %v1610_v42 = vld [vmem:[%s2085_s1 + $0x20] ss:$8 sps:$4 sm:$0xff] (!%p313_p2)   ;;  %v1615_v44 = vld [vmem:[%s2085_s1 + $0x34] ss:$8 sps:$4 sm:$0xff] (!%p313_p2)  }
   0xd   : > { %s2096_s14 = smov (!%p350_p3, %s1371_s14), 1  ;;  %483 = vmatprep.subr.bf16.mxu0 %v1595_v5  ;;  %v1613_v45 = vld [vmem:[%s2085_s1 + $0x30] ss:$8 sps:$4 sm:$0xff]   ;;  %v1618_v46 = vld [vmem:[%s2085_s1 + $0x44] ss:$8 sps:$4 sm:$0xff]   ;;  %vm933_vm4 = vcmask 130048  }
   0xe   : > { %s1579_s25 = smul.u32 24, %s2096_s14  ;;  %v1616_v47 = vld [vmem:[%s2085_s1 + $0x40] ss:$8 sps:$4 sm:$0xff]   ;;  %v1621_v48 = vld [vmem:[%s2085_s1 + $0xa4] ss:$8 sps:$4 sm:$0xff]   ;;  %v1635_v62 = vld [vmem:[%s2086_s2 + $0x50] sm:$0xff]  }
   0xf   : > { %v1619_v49 = vld [vmem:[%s2085_s1 + $0xa0] ss:$8 sps:$4 sm:$0xff]   ;;  %v1624_v50 = vld [vmem:[%s2085_s1 + $0xb4] ss:$8 sps:$4 sm:$0xff]   ;;  %v1622_v51 = vld [vmem:[%s2085_s1 + $0xb0] ss:$8 sps:$4 sm:$0xff]  }
  0x10   : > { %s354_s28 = scalar_lea.vmem %s2084_s0, %s1579_s25  ;;  %484 = vmatpush1.bf16.msra.mxu0 %v1597_v6  ;;  %v1627_v52 = vld [vmem:[%s2085_s1 + $0xc4] ss:$8 sps:$4 sm:$0xff]   ;;  %v1625_v53 = vld [vmem:[%s2085_s1 + $0xc0] ss:$8 sps:$4 sm:$0xff]   ;;  %v1630_v54 = vld [vmem:[%s2085_s1 + $0xd4] ss:$8 sps:$4 sm:$0xff]  }
  0x11   : > { %v1762_v8 = vld [vmem:[%s354_s28] sm:$0xff]  ;;  %v1764_v9 = vld [vmem:[%s354_s28 + $0x8] sm:$0xff]  ;;  %v1766_v10 = vld [vmem:[%s354_s28 + $0x10] sm:$0xf]  ;;  %485 = vmatprep.subr.bf16.mxu0 %v1598_v7  ;;  %s1507_s25 = sshll.u32 %s2096_s14, 4 }
  0x12   : > { %v364_v11 = vmax.f32 %v1762_v8, 0.0  ;;  %v365_v12 = vmax.f32 %v1764_v9, 0.0  ;;  %v366_v13 = vmax.f32 %v1766_v10, 0.0  ;;  %v1628_v55 = vld [vmem:[%s2085_s1 + $0xd0] ss:$8 sps:$4 sm:$0xff]   ;;  %v1634_v61 = vld [vmem:[%s2086_s2 + $0x48] sm:$0xff]   ;;  %s359_s30 = scalar_lea.vmem %s2094_s10, %s1507_s25 }
  0x13   : > { %v1633_v56 = vld [vmem:[%s2085_s1 + $0xe4] ss:$8 sps:$4 sm:$0xff]   ;;  %v1631_v57 = vld [vmem:[%s2085_s1 + $0xe0] ss:$8 sps:$4 sm:$0xff]   ;;  %938 = vmatpush1.bf16.msra.mxu1 %v1634_v61  ;;  %v1636_v63 = vld [vmem:[%s2086_s2 + $0x58] sm:$0xff]  }
  0x14   : > { %v374_v19 = vmul.f32 %v1379_v14, %v364_v11  ;;  %v375_v20 = vmul.f32 %v1379_v14, %v365_v12  ;;  %v376_v21 = vmul.f32 %v1379_v14, %v366_v13  ;;  %486 = vmatpush1.bf16.msra.mxu0 %v1600_v18  ;;  %939 = vmatprep.subr.bf16.mxu1 %v1669_v2  ;;  %v1637_v0 = vld [vmem:[%s2086_s2 + $0x60] sm:$0xff]   ;;  %v1638_v1 = vld [vmem:[%s2086_s2 + $0x68] sm:$0xff]   ;;  %v1639_v3 = vld [vmem:[%s2086_s2 + $0x70] sm:$0xff]  }
  0x15   : > { %487 = vmatprep.subr.bf16.mxu0 %v1601_v22  ;;  %v1640_v4 = vld [vmem:[%s2086_s2 + $0x78] sm:$0xff]   ;;  %v1641_v5 = vld [vmem:[%s2086_s2 + $0x80] sm:$0xff]   ;;  %v1642_v6 = vld [vmem:[%s2086_s2 + $0x88] sm:$0xff]  }
  0x16   : > { %v380_v23 = vadd.f32 %v377_v15, %v374_v19  ;;  %v381_v24 = vadd.f32 %v378_v16, %v375_v20  ;;  %v382_v25 = vadd.f32 %v379_v17, %v376_v21  ;;  %v1205_v7 = vld [vmem:[%s2087_s3] sm:$0xff]  ;;  %v1206_v11 = vld [vmem:[%s2087_s3 + $0x8] sm:$0xff]  ;;  %v1207_v13 = vld [vmem:[%s2087_s3 + $0x10] sm:$0xff] }
  0x17   : > { %940 = vmatpush1.bf16.msra.mxu1 %v1635_v62  ;;  %v1543_v12 = vpack.c.bf16 %v1206_v11, %v1205_v7  ;;  %v1208_v14 = vld [vmem:[%s2087_s3 + $0x18] sm:$0xff]  ;;  %v1209_v16 = vld [vmem:[%s2087_s3 + $0x20] sm:$0xff]  ;;  %v1210_v17 = vld [vmem:[%s2087_s3 + $0x28] sm:$0xff] }
  0x18   : > { %v1792_v27 = vpack.c.bf16 %v381_v24, %v380_v23  ;;  %v1794_v28 = vpack.c.bf16 %v382_v25, %v382_v25  ;;  %488 = vmatpush1.bf16.msra.mxu0 %v1603_v26  ;;  %941 = vmatprep.subr.bf16.mxu1 %v1669_v2  ;;  %v1547_v15 = vpack.c.bf16 %v1208_v14, %v1207_v13  ;;  %v1211_v19 = vld [vmem:[%s2087_s3 + $0x30] sm:$0xff]  ;;  %v1212_v20 = vld [vmem:[%s2087_s3 + $0x38] sm:$0xff]  ;;  %v1213_v22 = vld [vmem:[%s2087_s3 + $0x40] sm:$0xff]  ;;  %v1219_v25 = vrot.slane %v1762_v8, 2 }
  0x19   : > { %584 = vmatprep.subr.bf16.mxu0 %v1606_v29  ;;  %v1551_v18 = vpack.c.bf16 %v1210_v17, %v1209_v16  ;;  %v1555_v21 = vpack.c.bf16 %v1212_v20, %v1211_v19  ;;  %v1214_v23 = vld [vmem:[%s2087_s3 + $0x48] sm:$0xff]  ;;  %v1220_v26 = vrot.slane %v1764_v9, 2  ;;  %v803_v62 = vld [vmem:[%s2092_s8 + $0x10] sm:$0xff] }
  0x1a   : > { %v408_v30 = vshrl.u32 %v1792_v27, 16  ;;  %v410_v31 = vshll.u32 %v1792_v27, 16  ;;  %v415_v32 = vshll.u32 %v1794_v28, 16  ;;  %v419_v40 = vshrl.u32 %v1794_v28, 16 }
  0x1b   : > { %v649_v58 = vrot.slane %v1792_v27, 1  ;;  %v650_v59 = vrot.slane %v1794_v28, 1  ;;  %942 = vmatpush1.bf16.msra.mxu1 %v1636_v63  ;;  %v1559_v24 = vpack.c.bf16 %v1214_v23, %v1213_v22 }
  0x1c   : > { %v412_v33 = vrot.slane %v410_v31, 1  ;;  %v417_v34 = vrot.slane %v415_v32, 1  ;;  %943 = vmatprep.subr.bf16.mxu1 %v1669_v2 }
  0x1d   : > { %v651_v60 = vsel %vm648_vm2, %v649_v58, %v650_v59 }
  0x1e   : > { %v413_v36 = vor.u32 %v412_v33, %v408_v30  ;;  %v421_v43 = vor.u32 %v419_v40, %v417_v34  ;;  %v1221_v30 = vsel %vm1218_vm3, %v1219_v25, %v1220_v26  ;;  %v805_v25 = vld [vmem:[%s2092_s8 + $0x20] sm:$0x3] }
  0x1f   : > { %944 = vmatpush1.bf16.msra.mxu1 %v1637_v0  ;;  %v802_v0 = vld [vmem:[%s2092_s8 + $0x8] sm:$0xff] }
  0x20   : > { %v418_v38 = vsel %vm406_vm0, %v413_v36, %v417_v34  ;;  %945 = vmatprep.subr.bf16.mxu1 %v1669_v2  ;;  %v767_v34 = vlaneseq }
  0x21   : > { %1400 = vmatmul.mubr.msk.bf16.vlgmr.msra.gmra.mrb[0].mxu0 %vm472_vm1, %v418_v38 }
  0x22   : > { %585 = vmatpush1.bf16.msra.mxu0 %v1604_v35  ;;  %521 = vmatprep.mubr.bf16.mxu0 %v1669_v2 }
  0x23   : > { %586 = vmatprep.subr.bf16.mxu0 %v1609_v37  ;;  %946 = vmatpush1.bf16.msra.mxu1 %v1638_v1  ;;  %v768_v37 = vshrl.u32 %v767_v34, 7 }
  0x24   : > { %947 = vmatprep.subr.bf16.mxu1 %v1669_v2 }
  0x25   : > { %v769_v40 = vsub.s32 0, %v768_v37 }
  0x26   : > { %587 = vmatpush1.bf16.msra.mxu0 %v1607_v39 }
  0x27   : > { %588 = vmatprep.subr.bf16.mxu0 %v1612_v41  ;;  %948 = vmatpush1.bf16.msra.mxu1 %v1639_v3  ;;  %v773_v41 = vsub.s32 1, %v768_v37  ;;  %v804_v3 = vld [vmem:[%s2092_s8 + $0x18] sm:$0xff] }
  0x28   : > { %949 = vmatprep.subr.bf16.mxu1 %v1669_v2 }
  0x29   : > { %1401 = vmatmul.mubr.msk.bf16.gmra.mrb[4].mxu0 %vm472_vm1, %v421_v43 }
  0x2a   : > { %589 = vmatpush1.bf16.msra.mxu0 %v1610_v42  ;;  %616 = vmatprep.mubr.bf16.mxu0 %v1669_v2 }
  0x2b   : > { %590 = vmatprep.subr.bf16.mxu0 %v1615_v44  ;;  %950 = vmatpush1.bf16.msra.mxu1 %v1640_v4 }
  0x2c   : > { %951 = vmatprep.subr.bf16.mxu1 %v1669_v2 }
  0x2e   : > { %591 = vmatpush1.bf16.msra.mxu0 %v1613_v45 }
  0x2f   : > { %592 = vmatprep.subr.bf16.mxu0 %v1618_v46  ;;  %952 = vmatpush1.bf16.msra.mxu1 %v1641_v5 }
  0x30   : > { %953 = vmatprep.subr.bf16.mxu1 %v1669_v2 }
  0x32   : > { %593 = vmatpush1.bf16.msra.mxu0 %v1616_v47  ;;  %v789_v47 = vld [vmem:[%s2091_s7] sm:$0xff] }
  0x33   : > { %708 = vmatprep.subr.bf16.mxu0 %v1621_v48  ;;  %954 = vmatpush1.bf16.msra.mxu1 %v1642_v6 }
  0x34   : > { %1034 = vmatprep.subr.bf16.mxu1 %v1669_v2 }
  0x35   : > { %1412 = vmatmul.mubr.msk.bf16.vlgmr.msra.gmra.mrb[0].mxu0 %vm472_vm1, %v1792_v27 }
  0x36   : > { %709 = vmatpush1.bf16.msra.mxu0 %v1619_v49  ;;  %626 = vmatprep.mubr.bf16.mxu0 %v1669_v2 }
  0x37   : > { %710 = vmatprep.subr.bf16.mxu0 %v1624_v50 }
  0x3a   : > { %711 = vmatpush1.bf16.msra.mxu0 %v1622_v51  ;;  %v790_v51 = vld [vmem:[%s2091_s7 + $0x8] sm:$0xff] }
  0x3b   : > { %712 = vmatprep.subr.bf16.mxu0 %v1627_v52 }
  0x3d   : > { %1413 = vmatmul.mubr.msk.bf16.gmra.mrb[8].mxu0 %vm472_vm1, %v1794_v28  ;;  %v1222_v28 = vrot.slane %v1766_v10, 2  ;;  %v765_v10 = vld [vmem:[%s2090_s6] sm:$0x3] }
  0x3e   : > { %713 = vmatpush1.bf16.msra.mxu0 %v1625_v53  ;;  %740 = vmatprep.mubr.bf16.mxu0 %v1669_v2  ;;  %v770_v42 = vrot.slane %v765_v10, %v769_v40  ;;  %v774_v43 = vrot.slane %v765_v10, %v773_v41 }
  0x3f   : > { %714 = vmatprep.subr.bf16.mxu0 %v1630_v54  ;;  %v1223_v32 = vsel %vm1218_vm3, %v1220_v26, %v1222_v28  ;;  %v806_v28 = vld [vmem:[%s2092_s8 + $0x28] sm:$0x3] }
  0x42   : > { %715 = vmatpush1.bf16.msra.mxu0 %v1628_v55  ;;  %v791_v55 = vld [vmem:[%s2091_s7 + $0x10] sm:$0xff] }
  0x43   : > { %716 = vmatprep.subr.bf16.mxu0 %v1633_v56 }
  0x46   : > { %717 = vmatpush1.bf16.msra.mxu0 %v1631_v57 }
  0x47   : > { %1544 = vmatprep.subr.bf16.mxu0 %v1543_v12 }
  0x49   : > { %1434 = vmatmul.mubr.msk.bf16.vlgmr.msra.gmra.mrb[0].mxu0 %vm472_vm1, %v651_v60  ;;  %v801_v60 = vld [vmem:[%s2092_s8] sm:$0xff] }
  0x4a   : > { %750 = vmatprep.mubr.bf16.mxu0 %v1669_v2  ;;  %1546 = vmatpush3.bf16.msra.mxu0 %v1543_v12 }
  0x4b   : > { %1548 = vmatprep.subr.bf16.mxu0 %v1547_v15 }
  0x4e   : > { %1550 = vmatpush3.bf16.msra.mxu0 %v1547_v15 }
  0x4f   : > { %1552 = vmatprep.subr.bf16.mxu0 %v1551_v18 }
  0x51   : > { %1435 = vmatmul.mubr.msk.bf16.gmra.mrb[12].mxu0 %vm472_vm1, %v650_v59  ;;  %v792_v59 = vld [vmem:[%s2091_s7 + $0x18] sm:$0xff] }
  0x52   : > { %1554 = vmatpush3.bf16.msra.mxu0 %v1551_v18  ;;  %1540 = vmatprep.mubr.msk.f32.mxu0 %vm472_vm1, %v1221_v30 }
  0x53   : > { %1556 = vmatprep.subr.bf16.mxu0 %v1555_v21 }
  0x56   : > { %1558 = vmatpush3.bf16.msra.mxu0 %v1555_v21  ;;  %v793_v21 = vld [vmem:[%s2091_s7 + $0x20] sm:$0x3] }
  0x57   : > { %1560 = vmatprep.subr.bf16.mxu0 %v1559_v24 }
  0x5a   : > { %1562 = vmatpush3.bf16.msra.mxu0 %v1559_v24  ;;  %v794_v24 = vld [vmem:[%s2091_s7 + $0x28] sm:$0x3] }
  0x5d   : > { %1541 = vmatmul.mubr.msk.f32.vlgmr.msra.gmra.mrb[16].mxu0 %vm472_vm1, %v1223_v32 }
  0xfc   : > { %v523_v27 = vpop.f32.mrb[4].mxu0 }
  0xfd   : > { %v525_v29 = vpop.f32.mrb[5].mxu0 }
  0xfe   : > { %v527_v31 = vpop.f32.mrb[6].mxu0 }
  0xff   : > { %v528_v33 = vpop.f32.mrb[7].mxu0 }
 0x110   : > { %v628_v35 = vpop.f32.mrb[8].mxu0 }
 0x111   : > { %v629_v36 = vadd.f32 %v628_v35, %v523_v27  ;;  %v630_v8 = vpop.f32.mrb[9].mxu0 }
 0x112   : > { %v631_v9 = vadd.f32 %v630_v8, %v525_v29  ;;  %v632_v38 = vpop.f32.mrb[10].mxu0 }
 0x113   : > { %v633_v39 = vpop.f32.mrb[11].mxu0 }
 0x11c   : > { %v742_v44 = vpop.f32.mrb[0].mxu0 }
 0x11d   : > { %v777_v45 = vadd.f32 %v770_v42, %v742_v44  ;;  %v744_v46 = vpop.f32.mrb[1].mxu0 }
 0x11e   : > { %v778_v48 = vadd.f32 %v774_v43, %v744_v46  ;;  %v746_v49 = vpop.f32.mrb[2].mxu0 }
 0x11f   : > { %v783_v50 = vmax.f32 %v777_v45, 0.0  ;;  %v779_v52 = vadd.f32 %v770_v42, %v746_v49  ;;  %v748_v53 = vpop.f32.mrb[3].mxu0 }
 0x120   : > { %v784_v54 = vmax.f32 %v778_v48, 0.0  ;;  %v780_v56 = vadd.f32 %v774_v43, %v748_v53  ;;  %v1645_v53 = vld [vmem:[%s2086_s2 + $0x10] sm:$0xff]  }
 0x121   : > { %v795_v57 = vmul.f32 %v789_v47, %v783_v50  ;;  %v785_v58 = vmax.f32 %v779_v52, 0.0  ;;  %v1643_v50 = vld [vmem:[%s2086_s2] sm:$0xff]   ;;  %v1644_v52 = vld [vmem:[%s2086_s2 + $0x8] sm:$0xff]  }
 0x122   : > { %v796_v61 = vmul.f32 %v790_v51, %v784_v54  ;;  %v786_v63 = vmax.f32 %v780_v56, 0.0  ;;  %v1646_v54 = vld [vmem:[%s2086_s2 + $0x18] sm:$0xff]   ;;  %v1648_v56 = vld [vmem:[%s2086_s2 + $0x28] sm:$0xff]  }
 0x123   : > { %v797_v1 = vmul.f32 %v791_v55, %v785_v58  ;;  %v807_v6 = vadd.f32 %v801_v60, %v795_v57  ;;  %v1647_v55 = vld [vmem:[%s2086_s2 + $0x20] sm:$0xff]   ;;  %v1649_v57 = vld [vmem:[%s2086_s2 + $0x30] sm:$0xff]   ;;  %v1650_v58 = vld [vmem:[%s2086_s2 + $0x38] sm:$0xff]  }
 0x124   : > { %v798_v4 = vmul.f32 %v792_v59, %v786_v63  ;;  %v752_v5 = vpop.f32.mrb[12].mxu0  ;;  %v808_v13 = vadd.f32 %v802_v0, %v796_v61  ;;  %v1651_v59 = vld [vmem:[%s2086_s2 + $0x40] sm:$0xff]   ;;  %v1652_v60 = vld [vmem:[%s2086_s2 + $0x90] sm:$0xff]   ;;  %v1653_v61 = vld [vmem:[%s2086_s2 + $0x98] sm:$0xff]  }
 0x125   : > { %v809_v7 = vadd.f32 %v803_v62, %v797_v1  ;;  %v763_v11 = vadd.f32 %v752_v5, %v629_v36  ;;  %v754_v12 = vpop.f32.mrb[13].mxu0  ;;  %v1654_v62 = vld [vmem:[%s2086_s2 + $0xa0] sm:$0xff]   ;;  %v1655_v63 = vld [vmem:[%s2086_s2 + $0xa8] sm:$0xff]   ;;  %v1656_v0 = vld [vmem:[%s2086_s2 + $0xb0] sm:$0xff]  }
 0x126   : > { %v810_v14 = vadd.f32 %v804_v3, %v798_v4  ;;  %v764_v15 = vadd.f32 %v754_v12, %v631_v9  ;;  %v756_v16 = vpop.f32.mrb[14].mxu0  ;;  %v1657_v1 = vld [vmem:[%s2086_s2 + $0xb8] sm:$0xff]   ;;  %v1658_v3 = vld [vmem:[%s2086_s2 + $0xc0] sm:$0xff]   ;;  %v1659_v4 = vld [vmem:[%s2086_s2 + $0xc8] sm:$0xff]  }
 0x127   : > { %v1975_v17 = vpack.c.bf16 %v809_v7, %v807_v6  ;;  %v781_v18 = vadd.f32 %v770_v42, %v763_v11  ;;  %v757_v19 = vpop.f32.mrb[15].mxu0  ;;  %v1660_v5 = vld [vmem:[%s2086_s2 + $0xd0] sm:$0xff]   ;;  %v1504_v12 = vld [vmem:[%s2093_s9] ss:$0 sm:$0xff] }
 0x128   : > { %v814_v20 = vpack.c.bf16 %v810_v14, %v808_v13  ;;  %v782_v22 = vadd.f32 %v774_v43, %v764_v15 }
 0x129   : > { %v787_v23 = vmax.f32 %v781_v18, 0.0  ;;  %v857_v29 = vshll.u32 %v1975_v17, 16  ;;  %v855_v37 = vshrl.u32 %v1975_v17, 16  ;;  %v1098_v38 = vrot.slane %v1975_v17, 1 }
 0x12a   : > { %v788_v26 = vmax.f32 %v782_v22, 0.0  ;;  %v869_v31 = vshll.u32 %v814_v20, 16  ;;  %v867_v40 = vshrl.u32 %v814_v20, 16  ;;  %v1101_v41 = vrot.slane %v814_v20, 1 }
 0x12b   : > { %v799_v27 = vmul.f32 %v793_v21, %v787_v23  ;;  %v859_v35 = vrot.slane %v857_v29, 1 }
 0x12c   : > { %v800_v30 = vmul.f32 %v794_v24, %v788_v26  ;;  %v871_v8 = vrot.slane %v869_v31, 1 }
 0x12d   : > { %v811_v32 = vadd.f32 %v805_v25, %v799_v27  ;;  %v860_v43 = vor.u32 %v859_v35, %v855_v37 }
 0x12e   : > { %v812_v33 = vadd.f32 %v806_v28, %v800_v30  ;;  %v872_v46 = vor.u32 %v871_v8, %v867_v40 }
 0x12f   : > { %v815_v34 = vpack.c.bf16 %v811_v32, %v811_v32 }
 0x130   : > { %v816_v36 = vpack.c.bf16 %v812_v33, %v812_v33  ;;  %v1542_v6 = vpop.f32.mrb[16].mxu0 }
 0x131   : > { %v862_v9 = vshll.u32 %v815_v34, 16  ;;  %v1099_v39 = vrot.slane %v815_v34, 1  ;;  %v1294_v7 = vpop.f32.mrb[17].mxu0 }
 0x132   : > { %v874_v10 = vshll.u32 %v816_v36, 16  ;;  %v1102_v42 = vrot.slane %v816_v36, 1 }
 0x133   : > { %v864_v44 = vrot.slane %v862_v9, 1  ;;  %v1993_v45 = vsel %vm648_vm2, %v1098_v38, %v1099_v39 }
 0x134   : > { %v876_v47 = vrot.slane %v874_v10, 1  ;;  %v1103_v48 = vsel %vm648_vm2, %v1101_v41, %v1102_v42 }
 0x135   : > { %v865_v49 = vsel %vm406_vm0, %v860_v43, %v864_v44 }
 0x136   : > { %v877_v51 = vsel %vm406_vm0, %v872_v46, %v876_v47 }
 0x137   : > { %1463 = vmatprep.mubr.msk.bf16.mxu1 %vm933_vm4, %v877_v51 }
 0x138   : > { %970 = vmatmul.mubr.bf16.vlgmr.msra.gmra.mrb[0].mxu1 %v865_v49 }
 0x139   : > { %1035 = vmatpush1.bf16.msra.mxu1 %v1643_v50  ;;  %1473 = vmatprep.mubr.msk.bf16.mxu1 %vm933_vm4, %v814_v20 }
 0x13a   : > { %1036 = vmatprep.subr.bf16.mxu1 %v1669_v2 }
 0x13d   : > { %1037 = vmatpush1.bf16.msra.mxu1 %v1644_v52 }
 0x13e   : > { %1038 = vmatprep.subr.bf16.mxu1 %v1669_v2 }
 0x141   : > { %1039 = vmatpush1.bf16.msra.mxu1 %v1645_v53 }
 0x142   : > { %1040 = vmatprep.subr.bf16.mxu1 %v1669_v2 }
 0x145   : > { %1041 = vmatpush1.bf16.msra.mxu1 %v1646_v54 }
 0x146   : > { %1042 = vmatprep.subr.bf16.mxu1 %v1669_v2 }
 0x149   : > { %1043 = vmatpush1.bf16.msra.mxu1 %v1647_v55 }
 0x14a   : > { %1044 = vmatprep.subr.bf16.mxu1 %v1669_v2 }
 0x14d   : > { %1045 = vmatpush1.bf16.msra.mxu1 %v1648_v56 }
 0x14e   : > { %1046 = vmatprep.subr.bf16.mxu1 %v1669_v2 }
 0x151   : > { %1047 = vmatpush1.bf16.msra.mxu1 %v1649_v57 }
 0x152   : > { %1048 = vmatprep.subr.bf16.mxu1 %v1669_v2 }
 0x155   : > { %1049 = vmatpush1.bf16.msra.mxu1 %v1650_v58 }
 0x156   : > { %1050 = vmatprep.subr.bf16.mxu1 %v1669_v2 }
 0x159   : > { %1051 = vmatpush1.bf16.msra.mxu1 %v1651_v59 }
 0x15a   : > { %1162 = vmatprep.subr.bf16.mxu1 %v1669_v2 }
 0x15c   : > { %1067 = vmatmul.mubr.bf16.vlgmr.msra.gmra.mrb[0].mxu1 %v1975_v17 }
 0x15d   : > { %1163 = vmatpush1.bf16.msra.mxu1 %v1652_v60  ;;  %1501 = vmatprep.mubr.msk.bf16.mxu1 %vm933_vm4, %v1103_v48 }
 0x15e   : > { %1164 = vmatprep.subr.bf16.mxu1 %v1669_v2 }
 0x161   : > { %1165 = vmatpush1.bf16.msra.mxu1 %v1653_v61 }
 0x162   : > { %1166 = vmatprep.subr.bf16.mxu1 %v1669_v2 }
 0x165   : > { %1167 = vmatpush1.bf16.msra.mxu1 %v1654_v62 }
 0x166   : > { %1168 = vmatprep.subr.bf16.mxu1 %v1669_v2 }
 0x169   : > { %1169 = vmatpush1.bf16.msra.mxu1 %v1655_v63 }
 0x16a   : > { %1170 = vmatprep.subr.bf16.mxu1 %v1669_v2 }
 0x16d   : > { %1171 = vmatpush1.bf16.msra.mxu1 %v1656_v0 }
 0x16e   : > { %1172 = vmatprep.subr.bf16.mxu1 %v1669_v2 }
 0x171   : > { %1173 = vmatpush1.bf16.msra.mxu1 %v1657_v1 }
 0x172   : > { %1174 = vmatprep.subr.bf16.mxu1 %v1669_v2 }
 0x175   : > { %1175 = vmatpush1.bf16.msra.mxu1 %v1658_v3 }
 0x176   : > { %1176 = vmatprep.subr.bf16.mxu1 %v1669_v2 }
 0x179   : > { %1177 = vmatpush1.bf16.msra.mxu1 %v1659_v4 }
 0x17a   : > { %1178 = vmatprep.subr.bf16.mxu1 %v1669_v2 }
 0x17d   : > { %1179 = vmatpush1.bf16.msra.mxu1 %v1660_v5 }
 0x180   : > { %1195 = vmatmul.mubr.bf16.vlgmr.msra.gmra.mrb[0].mxu1 %v1993_v45 }
 0x253   : > { %v1196_v11 = vpop.f32.mrb[0].mxu1 }
 0x254   : > { %v1303_v13 = vadd.f32 %v1294_v7, %v1196_v11  ;;  %v1198_v14 = vpop.f32.mrb[1].mxu1 }
 0x255   : > { %v1199_v15 = vpop.f32.mrb[2].mxu1 }
 0x256   : > { %v1312_v16 = vadd.f32 %v1504_v12, %v1303_v13  ;;  %v1304_v2 = vadd.f32 %v1542_v6, %v1199_v15  ;;  %v1201_v17 = vpop.f32.mrb[3].mxu1 }
 0x258   : > { %1314 = vst [vmem:[%s359_s30] sm:$0xff] %v1312_v16  ;;  %v1313_v18 = vadd.f32 %v1504_v12, %v1304_v2 }
 0x25a   : > { %1315 = vst [vmem:[%s359_s30 + $0x8] sm:$0xff] %v1313_v18 }
 0x25b PF: > { %s20_s13 = sadd.s32 1, %s1667_s13  }
 0x25c   : > { %p17_p4 = scmp.ge.s32.totalorder %s20_s13, 4  }
 0x25e   :  { %19 = sbr.rel (!%p17_p4) target bundleno = 1 (0x1), region = 94 }

</bundles_post_ra>
